<compile_context>
chip_gen: v7x
topology: tpu7x:2x2x1
jax: 0.10.0
libtpu: 0.0.40
codegen_flags: <defaults>
</compile_context>

<pallas_src>
import jax
import jax.numpy as jnp
import numpy as np
from jax.experimental import pallas as pl
from jax.experimental.pallas import tpu as pltpu

_LANE = 128        # TPU lane width; every layer is padded into a 128-wide slab.
_BIAS_ROW = 127    # slab row (== activation column) that carries the folded bias.
_SUBLANE = 8       # f32 sublane granularity for the batch dimension.


def _fcnet_fused_kernel(x_ref, slab_ref, o_ref):
    """Fused MLP: (Linear -> ReLU) * (L-1) -> Linear, all on-chip.

    x_ref:    [TB, 128]     input features in cols [0, in_dim), zeros elsewhere.
    slab_ref: [L, 128, 128] layer i weights in rows [0, in_i), bias in row 127,
                            zero everywhere else.
    o_ref:    [TB, 128]     final output in col 0, zeros elsewhere (lane-dense).
    """
    num_layers = slab_ref.shape[0]
    tb = x_ref.shape[0]

    col_ids = jax.lax.broadcasted_iota(jnp.int32, (tb, _LANE), 1)
    bias_one = jnp.where(col_ids == _BIAS_ROW, 1.0, 0.0).astype(jnp.float32)

    h = x_ref[...]
    for i in range(num_layers):
        # Column _BIAS_ROW is always 0 coming in (input padding / zero weight
        # column), so this just plants the 1 that multiplies the bias row.
        h = h + bias_one
        # NOTE: at these shapes (K<=33) the MXU runs near-empty and is
        # latency-bound; a VPU broadcast-MAC formulation was considered, but
        # jnp.dot keeps the kernel simple and leaves the VALU slots free.
        h = jnp.dot(h, slab_ref[i], preferred_element_type=jnp.float32)
        if i != num_layers - 1:
            h = jnp.maximum(h, 0.0)
    o_ref[...] = h.astype(o_ref.dtype)


def prepare_fcnet_params(params):
    """One-time packing of [(w, b), ...] into a single [L, 128, 128] f32 slab.

    w: [in, out] (PyTorch nn.Linear weight, transposed), b: [out].
    Bias is folded into row _BIAS_ROW of each layer matrix.
    """
    num_layers = len(params)
    slab = np.zeros((num_layers, _LANE, _LANE), np.float32)
    for i, (w, b) in enumerate(params):
        in_dim, out_dim = w.shape
        assert in_dim <= _BIAS_ROW, "input dim must leave room for the bias row"
        assert out_dim <= _BIAS_ROW, "output dim must leave the bias column free"
        slab[i, :in_dim, :out_dim] = np.asarray(w, np.float32)
        slab[i, _BIAS_ROW, :out_dim] = np.asarray(b, np.float32)
    return jnp.asarray(slab)


def make_fcnet_forward(out_dim: int = 1):
    """Returns a jitted forward(slab, x) -> [batch, out_dim]."""

    @jax.jit
    def forward(slab, x):
        batch, in_dim = x.shape
        num_layers = slab.shape[0]

        # Batch tile: whole (padded) batch for toy sizes, 256-row tiles for
        # large batches. Double-buffered tiles: 2*(256*128 + 256*128)*4B ~ 1 MiB
        # plus the 192 KiB slab -> comfortably under v7x's 64 MiB VMEM.
        tb = batch if batch <= 256 else 256
        tb = -(-tb // _SUBLANE) * _SUBLANE
        bpad = -(-batch // tb) * tb

        x_p = jnp.zeros((bpad, _LANE), jnp.float32).at[:batch, :in_dim].set(x)

        flops = 2 * bpad * _LANE * _LANE * num_layers
        bytes_accessed = (x_p.size + slab.size + bpad * _LANE) * 4

        out_padded = pl.pallas_call(
            _fcnet_fused_kernel,
            out_shape=jax.ShapeDtypeStruct((bpad, _LANE), jnp.float32),
            grid=(bpad // tb,),
            in_specs=[
                pl.BlockSpec((tb, _LANE), lambda i: (i, 0)),
                pl.BlockSpec((num_layers, _LANE, _LANE), lambda i: (0, 0, 0)),
            ],
            out_specs=pl.BlockSpec((tb, _LANE), lambda i: (i, 0)),
            compiler_params=pltpu.CompilerParams(
                dimension_semantics=("parallel",)),
            cost_estimate=pl.CostEstimate(
                flops=flops, transcendentals=0, bytes_accessed=bytes_accessed),
        )(x_p, slab)

        return out_padded[:batch, :out_dim]

    return forward


def init_fcnet_params(key, input_dim: int, hidden: list[int]):
    """Deterministic init matching FCNet(__init__) layer shapes.

    Mimics PyTorch nn.Linear default init: U(-1/sqrt(fan_in), 1/sqrt(fan_in)).
    Weights are stored as [in, out] (transposed vs. PyTorch's [out, in]).
    """
    params = []
    last = input_dim
    dims = list(hidden) + [1]
    for h in dims:
        key, kw, kb = jax.random.split(key, 3)
        bound = 1.0 / (last ** 0.5)
        w = jax.random.uniform(kw, (last, h), jnp.float32, -bound, bound)
        b = jax.random.uniform(kb, (h,), jnp.float32, -bound, bound)
        params.append((w, b))
        last = h
    return params


if __name__ == "__main__":
    # Boston housing: 13 features; small MLP.
    batch = 8
    input_dim = 13
    hidden = [32, 16]

    key = jax.random.PRNGKey(0)
    key, kx = jax.random.split(key)
    x = jax.random.normal(kx, (batch, input_dim), jnp.float32)

    params = init_fcnet_params(key, input_dim, hidden)

    # One-time param prep (hoisted out of the forward path).
    slab = prepare_fcnet_params(params)
    fcnet_forward = make_fcnet_forward(out_dim=1)

    out = fcnet_forward(slab, x)
    out = jax.block_until_ready(out)

    # Pure-JAX reference for a sanity check of semantics.
    ref = x
    for i, (w, b) in enumerate(params):
        ref = ref @ w + b
        if i != len(params) - 1:
            ref = jnp.maximum(ref, 0.0)
    assert out.shape == (batch, 1)
    assert jnp.allclose(out, ref, atol=1e-5, rtol=1e-5)

    print("KERNEL_OK")
</pallas_src>

<mosaic_0001>
module attributes {stable_mosaic.version = 11 : i64} {
  func.func @_fcnet_fused_kernel(%arg0: i32, %arg1: memref<8x128xf32, #tpu.memory_space<vmem>>, %arg2: memref<3x128x128xf32, #tpu.memory_space<vmem>>, %arg3: memref<8x128xf32, #tpu.memory_space<vmem>>) attributes {dimension_semantics = [#tpu.dimension_semantics<parallel>], iteration_bounds = array<i64: 1>, scalar_prefetch = 0 : i64, scratch_operands = 0 : i64, tpu.core_type = #tpu.core_type<tc>, window_params = [{transform_indices = @transform_0, window_bounds = array<i64: 8, 128>}, {pipeline_mode = #tpu.pipeline_mode<synchronous>, transform_indices = @transform_1, window_bounds = array<i64: 3, 128, 128>}, {transform_indices = @transform_2, window_bounds = array<i64: 8, 128>}]} {
    %0 = tpu.iota {dimensions = array<i32: 1>} : vector<8x128xi32>
    %c127_i32 = arith.constant 127 : i32
    %1 = vector.broadcast %c127_i32 : i32 to vector<8x128xi32>
    %2 = arith.cmpi eq, %0, %1 : vector<8x128xi32>
    %cst = arith.constant 1.000000e+00 : f32
    %cst_0 = arith.constant 0.000000e+00 : f32
    %3 = vector.broadcast %cst : f32 to vector<8x128xf32>
    %4 = vector.broadcast %cst_0 : f32 to vector<8x128xf32>
    %5 = arith.select %2, %3, %4 : vector<8x128xi1>, vector<8x128xf32>
    %c0 = arith.constant 0 : index
    %c0_1 = arith.constant 0 : index
    %6 = vector.load %arg1[%c0, %c0_1] : memref<8x128xf32, #tpu.memory_space<vmem>>, vector<8x128xf32>
    %7 = arith.addf %6, %5 : vector<8x128xf32>
    %c0_2 = arith.constant 0 : index
    %c0_3 = arith.constant 0 : index
    %c0_4 = arith.constant 0 : index
    %8 = vector.load %arg2[%c0_2, %c0_3, %c0_4] : memref<3x128x128xf32, #tpu.memory_space<vmem>>, vector<1x128x128xf32>
    %9 = vector.shape_cast %8 : vector<1x128x128xf32> to vector<128x128xf32>
    %cst_5 = arith.constant dense<0.000000e+00> : vector<8x128xf32>
    %10 = tpu.matmul %7, %9, %cst_5 {dimension_numbers = #tpu.dot_dimension_numbers<[1], [0], [0], [1], [0, 0, 1, 1], [], []>} : vector<8x128xf32>, vector<128x128xf32>, vector<8x128xf32> -> vector<8x128xf32>
    %cst_6 = arith.constant 0.000000e+00 : f32
    %11 = vector.broadcast %cst_6 : f32 to vector<8x128xf32>
    %12 = arith.maximumf %10, %11 : vector<8x128xf32>
    %13 = arith.addf %12, %5 : vector<8x128xf32>
    %c1 = arith.constant 1 : index
    %c0_7 = arith.constant 0 : index
    %c0_8 = arith.constant 0 : index
    %14 = vector.load %arg2[%c1, %c0_7, %c0_8] : memref<3x128x128xf32, #tpu.memory_space<vmem>>, vector<1x128x128xf32>
    %15 = vector.shape_cast %14 : vector<1x128x128xf32> to vector<128x128xf32>
    %cst_9 = arith.constant dense<0.000000e+00> : vector<8x128xf32>
    %16 = tpu.matmul %13, %15, %cst_9 {dimension_numbers = #tpu.dot_dimension_numbers<[1], [0], [0], [1], [0, 0, 1, 1], [], []>} : vector<8x128xf32>, vector<128x128xf32>, vector<8x128xf32> -> vector<8x128xf32>
    %cst_10 = arith.constant 0.000000e+00 : f32
    %17 = vector.broadcast %cst_10 : f32 to vector<8x128xf32>
    %18 = arith.maximumf %16, %17 : vector<8x128xf32>
    %19 = arith.addf %18, %5 : vector<8x128xf32>
    %c2 = arith.constant 2 : index
    %c0_11 = arith.constant 0 : index
    %c0_12 = arith.constant 0 : index
    %20 = vector.load %arg2[%c2, %c0_11, %c0_12] : memref<3x128x128xf32, #tpu.memory_space<vmem>>, vector<1x128x128xf32>
    %21 = vector.shape_cast %20 : vector<1x128x128xf32> to vector<128x128xf32>
    %cst_13 = arith.constant dense<0.000000e+00> : vector<8x128xf32>
    %22 = tpu.matmul %19, %21, %cst_13 {dimension_numbers = #tpu.dot_dimension_numbers<[1], [0], [0], [1], [0, 0, 1, 1], [], []>} : vector<8x128xf32>, vector<128x128xf32>, vector<8x128xf32> -> vector<8x128xf32>
    %c0_14 = arith.constant 0 : index
    %c0_15 = arith.constant 0 : index
    %23 = vector.load %arg3[%c0_14, %c0_15] : memref<8x128xf32, #tpu.memory_space<vmem>>, vector<8x128xf32>
    tpu.vector_store %arg3[%c0_14, %c0_15], %22 {strides = array<i32>} : memref<8x128xf32, #tpu.memory_space<vmem>>, vector<8x128xf32>,
    return
  }
  func.func @transform_0(%arg0: i32) -> (i32, i32) {
    %c0_i32 = arith.constant 0 : i32
    %c0_i32_0 = arith.constant 0 : i32
    return %arg0, %c0_i32 : i32, i32
  }
  func.func @transform_1(%arg0: i32) -> (i32, i32, i32) {
    %c0_i32 = arith.constant 0 : i32
    %c0_i32_0 = arith.constant 0 : i32
    %c0_i32_1 = arith.constant 0 : i32
    %c0_i32_2 = arith.constant 0 : i32
    return %c0_i32, %c0_i32_0, %c0_i32_1 : i32, i32, i32
  }
  func.func @transform_2(%arg0: i32) -> (i32, i32) {
    %c0_i32 = arith.constant 0 : i32
    %c0_i32_0 = arith.constant 0 : i32
    return %arg0, %c0_i32 : i32, i32
  }
}

</mosaic_0001>

<bundles_post_ra>
// kernel: forward.1
= control target key start
LH: loop header
LB: loop body
LE: loop exit
PB: predicated region body
PF: predicated region fallthrough
CT: control target
= control target key end

     0   :  { %7 = vsyncpa [#allocation3], 0  ;;  %s559_s9 = smov [#allocation2]   ;;  %s634_s0 = inlined_call_operand.vmem [shape: f32[8,128], index: 0, kind: input, shape index: {}]   ;;  %s635_s1 = inlined_call_operand.hbm [shape: f32[3,128,128], index: 1, kind: input, shape index: {}]   ;;  %s636_s2 = inlined_call_operand.vmem [shape: f32[8,128], index: 2, kind: output, shape index: {}]  }
   0x1   :  { %s15_s10 = sshll.u32 %s559_s9, 4  ;;  %s535_s13 = scalar_lea.hbm %s635_s1, 6144  ;;  %s16_s10 = int_to_ptr.vmem [resolvable:$true] %s15_s10 }
   0x2   :  { %p536_p0 = scmp.ne.s32.totalorder %s635_s1, %s535_s13  ;;  %p539_p1 = scmp.lt.u32.totalorder %s535_s13, %s635_s1 }
   0x4   :  { %p541_p2 = pnand %p539_p1, %p536_p0 }
   0x6   :  { %544 = shalt.err (!%p541_p2)
}
   0x7   :  { %s545_s18 = scalar_lea.vmem %s16_s10, 6144  ;;  %p550_p4 = scmp.lt.s32.totalorder %s16_s10, %s16_s10 }
   0x8   :  { %p546_p3 = scmp.ne.s32.totalorder %s16_s10, %s545_s18  ;;  %p551_p5 = scmp.lt.s32.totalorder %s545_s18, %s545_s18 }
   0xa   :  { %p552_p6 = por %p551_p5, %p550_p4 }
   0xc   :  { %p553_p7 = pnand %p552_p6, %p546_p3 }
   0xe   :  { %556 = shalt.err (!%p553_p7)
}
   0xf   :  { %s560_s19 = smov 128   ;;  %s561_s20 = smov 8  }
  0x10   :  { %21 = dma.hbm_to_vmem [thread:$0]  %s635_s1, 6144, %s16_s10, [#allocation3], %s560_s19, %s560_s19, %s561_s20  }
  0x11   :  { %557 = dma.done.wait [#allocation3], 6144  }
  0x12   :  { %558 = vsyncadd [#allocation3], 4294961152  ;;  %v562_v0 = vmov 0.0|0.0   ;;  %vm563_vm0 = vmmov 0   ;;  %v564_v1 = vmov 0.0   ;;  %v31_v2 = vld [vmem:[#allocation2] sm:$0xff]  ;;  %v25_v30 = vlaneseq }
  0x13   :  { %457 = vmatprep.subr.bf16.mxu0 %v562_v0  ;;  %384 = vmatprep.mubr.msk.f32.mxu0 %vm563_vm0, %v564_v1  ;;  %v32_v3 = vld [vmem:[#allocation2 + $0x8] sm:$0xff]  ;;  %v33_v4 = vld [vmem:[#allocation2 + $0x10] sm:$0xff]  ;;  %v34_v6 = vld [vmem:[#allocation2 + $0x18] sm:$0xff] }
  0x14   :  { %481 = vmatprep.subr.bf16.mxu1 %v562_v0  ;;  %419 = vmatprep.mubr.msk.f32.mxu1 %vm563_vm0, %v564_v1  ;;  %v458_v5 = vpack.c.bf16 %v32_v3, %v31_v2  ;;  %v461_v7 = vpack.c.bf16 %v34_v6, %v33_v4  ;;  %v35_v8 = vld [vmem:[#allocation2 + $0x20] sm:$0xff]  ;;  %v36_v9 = vld [vmem:[#allocation2 + $0x28] sm:$0xff]  ;;  %v122_v12 = vld [vmem:[#allocation2 + $0x90] sm:$0xff]  ;;  %v26_v37 = vand.u32 127, %v25_v30 }
  0x15   :  { %v120_v10 = vld [vmem:[#allocation2 + $0x80] sm:$0xff]  ;;  %v121_v11 = vld [vmem:[#allocation2 + $0x88] sm:$0xff]  ;;  %v123_v13 = vld [vmem:[#allocation2 + $0x98] sm:$0xff]  ;;  %v464_v14 = vpack.c.bf16 %v36_v9, %v35_v8 }
  0x16   :  { %459 = vmatpush3.bf16.msra.mxu0 %v458_v5  ;;  %v482_v15 = vpack.c.bf16 %v121_v11, %v120_v10  ;;  %v37_v16 = vld [vmem:[#allocation2 + $0x30] sm:$0xff]  ;;  %v38_v17 = vld [vmem:[#allocation2 + $0x38] sm:$0xff]  ;;  %v485_v18 = vpack.c.bf16 %v123_v13, %v122_v12  ;;  %v124_v19 = vld [vmem:[#allocation2 + $0xa0] sm:$0xff]  ;;  %vm27_vm1 = vcmp.eq.s32.totalorder %v26_v37, 127 }
  0x17   :  { %460 = vmatprep.subr.bf16.mxu0 %v562_v0  ;;  %v125_v20 = vld [vmem:[#allocation2 + $0xa8] sm:$0xff]  ;;  %v467_v21 = vpack.c.bf16 %v38_v17, %v37_v16  ;;  %v39_v22 = vld [vmem:[#allocation2 + $0x40] sm:$0xff]  ;;  %v126_v25 = vld [vmem:[#allocation2 + $0xb0] sm:$0xff]  ;;  %v610_v48 = vsel %vm27_vm1, 1.0, %v564_v1 }
  0x18   :  { %483 = vmatpush3.bf16.msra.mxu1 %v482_v15  ;;  %v40_v23 = vld [vmem:[#allocation2 + $0x48] sm:$0xff]  ;;  %v488_v24 = vpack.c.bf16 %v125_v20, %v124_v19  ;;  %v127_v26 = vld [vmem:[#allocation2 + $0xb8] sm:$0xff]  ;;  %v41_v28 = vld [vmem:[#allocation2 + $0x50] sm:$0xff] }
  0x19   :  { %484 = vmatprep.subr.bf16.mxu1 %v562_v0  ;;  %v470_v27 = vpack.c.bf16 %v40_v23, %v39_v22  ;;  %v42_v29 = vld [vmem:[#allocation2 + $0x58] sm:$0xff]  ;;  %v491_v31 = vpack.c.bf16 %v127_v26, %v126_v25  ;;  %v128_v32 = vld [vmem:[#allocation2 + $0xc0] sm:$0xff]  ;;  %v129_v33 = vld [vmem:[#allocation2 + $0xc8] sm:$0xff] }
  0x1a   :  { %462 = vmatpush3.bf16.msra.mxu0 %v461_v7  ;;  %v473_v34 = vpack.c.bf16 %v42_v29, %v41_v28  ;;  %v43_v35 = vld [vmem:[#allocation2 + $0x60] sm:$0xff]  ;;  %v44_v36 = vld [vmem:[#allocation2 + $0x68] sm:$0xff]  ;;  %v494_v38 = vpack.c.bf16 %v129_v33, %v128_v32  ;;  %v130_v39 = vld [vmem:[#allocation2 + $0xd0] sm:$0xff] }
  0x1b   :  { %463 = vmatprep.subr.bf16.mxu0 %v562_v0  ;;  %v131_v40 = vld [vmem:[#allocation2 + $0xd8] sm:$0xff]  ;;  %v476_v41 = vpack.c.bf16 %v44_v36, %v43_v35  ;;  %v45_v42 = vld [vmem:[#allocation2 + $0x70] sm:$0xff]  ;;  %v132_v45 = vld [vmem:[#allocation2 + $0xe0] sm:$0xff] }
  0x1c   :  { %486 = vmatpush3.bf16.msra.mxu1 %v485_v18  ;;  %v46_v43 = vld [vmem:[#allocation2 + $0x78] sm:$0xff]  ;;  %v497_v44 = vpack.c.bf16 %v131_v40, %v130_v39  ;;  %v133_v46 = vld [vmem:[#allocation2 + $0xe8] sm:$0xff]  ;;  %v29_v49 = vld [vmem:[%s634_s0] sm:$0xff] }
  0x1d   :  { %487 = vmatprep.subr.bf16.mxu1 %v562_v0  ;;  %v479_v47 = vpack.c.bf16 %v46_v43, %v45_v42  ;;  %v500_v50 = vpack.c.bf16 %v133_v46, %v132_v45  ;;  %v30_v51 = vadd.f32 %v29_v49, %v610_v48  ;;  %v134_v52 = vld [vmem:[#allocation2 + $0xf0] sm:$0xff]  ;;  %v135_v53 = vld [vmem:[#allocation2 + $0xf8] sm:$0xff]  ;;  %v209_v55 = vld [vmem:[#allocation2 + $0x100] sm:$0xff] }
  0x1e   :  { %465 = vmatpush3.bf16.msra.mxu0 %v464_v14  ;;  %v503_v54 = vpack.c.bf16 %v135_v53, %v134_v52  ;;  %v210_v56 = vld [vmem:[#allocation2 + $0x108] sm:$0xff]  ;;  %v211_v57 = vld [vmem:[#allocation2 + $0x110] sm:$0xff]  ;;  %v212_v59 = vld [vmem:[#allocation2 + $0x118] sm:$0xff] }
  0x1f   :  { %466 = vmatprep.subr.bf16.mxu0 %v562_v0  ;;  %v506_v58 = vpack.c.bf16 %v210_v56, %v209_v55  ;;  %v509_v60 = vpack.c.bf16 %v212_v59, %v211_v57  ;;  %v213_v61 = vld [vmem:[#allocation2 + $0x120] sm:$0xff]  ;;  %v214_v62 = vld [vmem:[#allocation2 + $0x128] sm:$0xff]  ;;  %v216_v2 = vld [vmem:[#allocation2 + $0x138] sm:$0xff] }
  0x20   :  { %489 = vmatpush3.bf16.msra.mxu1 %v488_v24  ;;  %v512_v63 = vpack.c.bf16 %v214_v62, %v213_v61  ;;  %v217_v4 = vld [vmem:[#allocation2 + $0x140] sm:$0xff]  ;;  %v218_v5 = vld [vmem:[#allocation2 + $0x148] sm:$0xff]  ;;  %v219_v7 = vld [vmem:[#allocation2 + $0x150] sm:$0xff] }
  0x21   :  { %490 = vmatprep.subr.bf16.mxu1 %v562_v0  ;;  %v518_v6 = vpack.c.bf16 %v218_v5, %v217_v4  ;;  %v220_v8 = vld [vmem:[#allocation2 + $0x158] sm:$0xff]  ;;  %v221_v10 = vld [vmem:[#allocation2 + $0x160] sm:$0xff]  ;;  %v222_v11 = vld [vmem:[#allocation2 + $0x168] sm:$0xff] }
  0x22   :  { %468 = vmatpush3.bf16.msra.mxu0 %v467_v21  ;;  %v521_v9 = vpack.c.bf16 %v220_v8, %v219_v7  ;;  %v524_v12 = vpack.c.bf16 %v222_v11, %v221_v10  ;;  %v223_v17 = vld [vmem:[#allocation2 + $0x170] sm:$0xff]  ;;  %v224_v18 = vld [vmem:[#allocation2 + $0x178] sm:$0xff] }
  0x23   :  { %469 = vmatprep.subr.bf16.mxu0 %v562_v0  ;;  %v527_v19 = vpack.c.bf16 %v224_v18, %v223_v17 }
  0x24   :  { %492 = vmatpush3.bf16.msra.mxu1 %v491_v31 }
  0x25   :  { %493 = vmatprep.subr.bf16.mxu1 %v562_v0 }
  0x26   :  { %471 = vmatpush3.bf16.msra.mxu0 %v470_v27 }
  0x27   :  { %472 = vmatprep.subr.bf16.mxu0 %v562_v0 }
  0x28   :  { %495 = vmatpush3.bf16.msra.mxu1 %v494_v38 }
  0x29   :  { %496 = vmatprep.subr.bf16.mxu1 %v562_v0 }
  0x2a   :  { %474 = vmatpush3.bf16.msra.mxu0 %v473_v34 }
  0x2b   :  { %475 = vmatprep.subr.bf16.mxu0 %v562_v0 }
  0x2c   :  { %498 = vmatpush3.bf16.msra.mxu1 %v497_v44 }
  0x2d   :  { %499 = vmatprep.subr.bf16.mxu1 %v562_v0 }
  0x2e   :  { %477 = vmatpush3.bf16.msra.mxu0 %v476_v41 }
  0x2f   :  { %478 = vmatprep.subr.bf16.mxu0 %v562_v0 }
  0x30   :  { %501 = vmatpush3.bf16.msra.mxu1 %v500_v50 }
  0x31   :  { %502 = vmatprep.subr.bf16.mxu1 %v562_v0 }
  0x32   :  { %480 = vmatpush3.bf16.msra.mxu0 %v479_v47 }
  0x33   :  { %505 = vmatprep.subr.bf16.mxu0 %v562_v0 }
  0x34   :  { %504 = vmatpush3.bf16.msra.mxu1 %v503_v54 }
  0x35   :  { %385 = vmatmul.mubr.f32.vlgmr.msra.gmra.mrb[0].mxu0 %v30_v51 }
  0x36   :  { %454 = vmatprep.mubr.msk.f32.mxu0 %vm563_vm0, %v564_v1  ;;  %507 = vmatpush3.bf16.msra.mxu0 %v506_v58  ;;  %v215_v1 = vld [vmem:[#allocation2 + $0x130] sm:$0xff] }
  0x37   :  { %508 = vmatprep.subr.bf16.mxu0 %v562_v0  ;;  %v515_v3 = vpack.c.bf16 %v216_v2, %v215_v1 }
  0x3a   :  { %510 = vmatpush3.bf16.msra.mxu0 %v509_v60 }
  0x3b   :  { %511 = vmatprep.subr.bf16.mxu0 %v562_v0 }
  0x3e   :  { %513 = vmatpush3.bf16.msra.mxu0 %v512_v63 }
  0x3f   :  { %514 = vmatprep.subr.bf16.mxu0 %v562_v0 }
  0x42   :  { %516 = vmatpush3.bf16.msra.mxu0 %v515_v3 }
  0x43   :  { %517 = vmatprep.subr.bf16.mxu0 %v562_v0 }
  0x46   :  { %519 = vmatpush3.bf16.msra.mxu0 %v518_v6 }
  0x47   :  { %520 = vmatprep.subr.bf16.mxu0 %v562_v0 }
  0x4a   :  { %522 = vmatpush3.bf16.msra.mxu0 %v521_v9 }
  0x4b   :  { %523 = vmatprep.subr.bf16.mxu0 %v562_v0 }
  0x4e   :  { %525 = vmatpush3.bf16.msra.mxu0 %v524_v12 }
  0x4f   :  { %526 = vmatprep.subr.bf16.mxu0 %v562_v0 }
  0x52   :  { %528 = vmatpush3.bf16.msra.mxu0 %v527_v19 }
 0x108   :  { %v113_v13 = vpop.f32.mrb[0].mxu0 }
 0x109   :  { %v117_v14 = vmax.f32 %v113_v13, 0.0  ;;  %v386_v15 = vpop.f32.mrb[1].mxu0 }
 0x10b   :  { %v118_v16 = vadd.f32 %v117_v14, %v610_v48 }
 0x10d   :  { %420 = vmatmul.mubr.f32.vlgmr.msra.gmra.mrb[0].mxu1 %v118_v16 }
 0x1e0   :  { %v202_v20 = vpop.f32.mrb[0].mxu1 }
 0x1e1   :  { %v206_v21 = vmax.f32 %v202_v20, 0.0  ;;  %v421_v22 = vpop.f32.mrb[1].mxu1 }
 0x1e3   :  { %v207_v23 = vadd.f32 %v206_v21, %v610_v48 }
 0x1e5   :  { %455 = vmatmul.mubr.f32.vlgmr.msra.gmra.mrb[2].mxu0 %v207_v23 }
 0x2b8   :  { %v291_v24 = vpop.f32.mrb[2].mxu0 }
 0x2b9   :  { %295 = vst [vmem:[%s636_s2] sm:$0xff] %v291_v24  ;;  %v456_v0 = vpop.f32.mrb[3].mxu0 }
 0x2ba   :  { %300 = vsyncpa [#allocation3], 1 }

</bundles_post_ra>
